<compile_context>
chip_gen: v7x
topology: tpu7x:2x2x1
jax: 0.10.0
libtpu: 0.0.40
codegen_flags: <defaults>
</compile_context>

<pallas_src>
import math
import functools

import jax
import jax.numpy as jnp
from jax import lax
from jax.experimental import pallas as pl
from jax.experimental.pallas import tpu as pltpu


def _mha_kernel(q_ref, k_ref, v_ref,
                wq_ref, bq_ref, wk_ref, bk_ref, wv_ref, bv_ref,
                wo_ref, bo_ref,
                o_ref,
                kp_ref, vp_ref, ctx_ref,
                *, head_num, compute_dtype):
    """One grid step = (batch b, query tile qi)."""
    qi = pl.program_id(1)

    # Project K and V once per batch element (first query tile only); results
    # persist in VMEM scratch across the "arbitrary" query-tile axis.
    @pl.when(qi == 0)
    def _project_kv():
        k = k_ref[0].astype(compute_dtype)                       # (S, F)
        v = v_ref[0].astype(compute_dtype)
        kp = jnp.maximum(
            jnp.dot(k, wk_ref[...], preferred_element_type=jnp.float32)
            + bk_ref[...], 0.0)
        vp = jnp.maximum(
            jnp.dot(v, wv_ref[...], preferred_element_type=jnp.float32)
            + bv_ref[...], 0.0)
        kp_ref[...] = kp.astype(kp_ref.dtype)
        vp_ref[...] = vp.astype(vp_ref.dtype)

    # Q projection for this query tile.  wq/bq were pre-scaled by 1/sqrt(d) on
    # the host, so no per-head score scaling is needed below.
    q = q_ref[0].astype(compute_dtype)                           # (TQ, F)
    qp = jnp.maximum(
        jnp.dot(q, wq_ref[...], preferred_element_type=jnp.float32)
        + bq_ref[...], 0.0).astype(compute_dtype)

    kp = kp_ref[...]                                             # (S, F)
    vp = vp_ref[...]

    F = qp.shape[-1]
    d = F // head_num

    # Per-head attention (scores are NOT softmaxed — matches the reference).
    # Each head's context is written directly into the (TQ, F) scratch slab, so
    # only one (TQ, S) score tile is live at a time and no concatenate is built.
    for h in range(head_num):                                    # static unroll
        sl = slice(h * d, (h + 1) * d)
        # q_h @ k_h^T expressed via dot_general -> no materialized transpose.
        scores = lax.dot_general(qp[:, sl], kp[:, sl],
                                 (((1,), (1,)), ((), ())),
                                 preferred_element_type=jnp.float32)     # (TQ, S)
        ctx_ref[:, sl] = jnp.dot(scores.astype(compute_dtype), vp[:, sl],
                                 preferred_element_type=jnp.float32)     # (TQ, d)

    # Output projection — full-F contraction on the merged-head slab.
    out = jnp.dot(ctx_ref[...].astype(compute_dtype), wo_ref[...],
                  preferred_element_type=jnp.float32) + bo_ref[...]
    o_ref[0] = out.astype(o_ref.dtype)


def multi_head_attention(q, k, v, params, head_num, *,
                         compute_dtype=jnp.float32, q_tile=None):
    """q, k, v: (B, S, F).  params: torch.nn.Linear-layout weights (out, in)."""
    B, S, F = q.shape
    assert F % head_num == 0
    d = F // head_num
    scale = 1.0 / math.sqrt(d)

    # ---- Host-side prep (hoisted out of the hot loop) ----
    # Fold the 1/sqrt(d) score scale into the Q projection (valid: ReLU(s*x) ==
    # s*ReLU(x) for s > 0), pre-transpose weights to (in, out), and cast the
    # MXU operands (weights) to the compute dtype once.
    wq_t = (params["wq"] * scale).T.astype(compute_dtype)
    wk_t = params["wk"].T.astype(compute_dtype)
    wv_t = params["wv"].T.astype(compute_dtype)
    wo_t = params["wo"].T.astype(compute_dtype)
    bq = (params["bq"] * scale).astype(jnp.float32)
    bk = params["bk"].astype(jnp.float32)
    bv = params["bv"].astype(jnp.float32)
    bo = params["bo"].astype(jnp.float32)

    # Query tile: full S for small sequences, otherwise a 128/256-aligned divisor.
    if q_tile is None:
        q_tile = S
        for cand in (256, 128):
            if S > cand and S % cand == 0:
                q_tile = cand
                break
    assert S % q_tile == 0
    nq = S // q_tile

    q_spec = pl.BlockSpec((1, q_tile, F), lambda b, i: (b, i, 0))
    kv_spec = pl.BlockSpec((1, S, F), lambda b, i: (b, 0, 0))
    w_spec = pl.BlockSpec((F, F), lambda b, i: (0, 0))
    b_spec = pl.BlockSpec((1, F), lambda b, i: (0, 0))

    kernel = functools.partial(_mha_kernel,
                               head_num=head_num, compute_dtype=compute_dtype)

    # Rough per-step VMEM budget (double-buffered tiles + weights + scratch).
    cbytes = jnp.dtype(compute_dtype).itemsize
    est = (2 * (q_tile * F + 2 * S * F) * q.dtype.itemsize        # q/k/v tiles
           + 2 * (4 * F * F * cbytes + 4 * F * 4)                 # weights/biases
           + 2 * (q_tile * F * q.dtype.itemsize)                  # output tile
           + (2 * S * F * cbytes + q_tile * F * 4)                # kp/vp/ctx scratch
           + (q_tile * S * 4))                                    # live score tile
    vmem_limit = int(min(max(2 * est, 16 * 1024 * 1024), 64 * 1024 * 1024))

    return pl.pallas_call(
        kernel,
        out_shape=jax.ShapeDtypeStruct((B, S, F), q.dtype),
        grid_spec=pltpu.PrefetchScalarGridSpec(
            num_scalar_prefetch=0,
            grid=(B, nq),
            in_specs=[q_spec, kv_spec, kv_spec,
                      w_spec, b_spec, w_spec, b_spec, w_spec, b_spec,
                      w_spec, b_spec],
            out_specs=q_spec,
            scratch_shapes=[pltpu.VMEM((S, F), compute_dtype),        # K proj
                            pltpu.VMEM((S, F), compute_dtype),        # V proj
                            pltpu.VMEM((q_tile, F), jnp.float32)],    # merged ctx
        ),
        compiler_params=pltpu.CompilerParams(
            dimension_semantics=("parallel", "arbitrary"),
            vmem_limit_bytes=vmem_limit),
    )(q, k, v, wq_t, bq, wk_t, bk, wv_t, bv, wo_t, bo)


def _reference(q, k, v, params, head_num):
    """Pure-JAX reference mirroring the PyTorch forward exactly."""
    def lin(x, w, b):
        return x @ w.T + b
    qp = jax.nn.relu(lin(q, params["wq"], params["bq"][0]))
    kp = jax.nn.relu(lin(k, params["wk"], params["bk"][0]))
    vp = jax.nn.relu(lin(v, params["wv"], params["bv"][0]))
    B, S, F = qp.shape
    d = F // head_num

    def to_batches(x):
        return x.reshape(B, S, head_num, d).transpose(0, 2, 1, 3).reshape(B * head_num, S, d)

    qb, kb, vb = to_batches(qp), to_batches(kp), to_batches(vp)
    scores = jnp.einsum("bqd,bkd->bqk", qb, kb) / math.sqrt(d)
    y = jnp.einsum("bqk,bkd->bqd", scores, vb)
    y = y.reshape(B, head_num, S, d).transpose(0, 2, 1, 3).reshape(B, S, F)
    return lin(y, params["wo"], params["bo"][0])


if __name__ == "__main__":
    B, S, F, H = 2, 8, 32, 4

    key = jax.random.PRNGKey(0)
    keys = jax.random.split(key, 12)
    scale = 1.0 / math.sqrt(F)

    params = {
        "wq": jax.random.uniform(keys[0], (F, F), jnp.float32, -scale, scale),
        "bq": jax.random.uniform(keys[1], (1, F), jnp.float32, -scale, scale),
        "wk": jax.random.uniform(keys[2], (F, F), jnp.float32, -scale, scale),
        "bk": jax.random.uniform(keys[3], (1, F), jnp.float32, -scale, scale),
        "wv": jax.random.uniform(keys[4], (F, F), jnp.float32, -scale, scale),
        "bv": jax.random.uniform(keys[5], (1, F), jnp.float32, -scale, scale),
        "wo": jax.random.uniform(keys[6], (F, F), jnp.float32, -scale, scale),
        "bo": jax.random.uniform(keys[7], (1, F), jnp.float32, -scale, scale),
    }

    q = jax.random.normal(keys[8], (B, S, F), jnp.float32)
    k = jax.random.normal(keys[9], (B, S, F), jnp.float32)
    v = jax.random.normal(keys[10], (B, S, F), jnp.float32)

    ref = _reference(q, k, v, params, H)

    # Exact (f32 MXU) path — matches the PyTorch module to tight tolerance.
    out = multi_head_attention(q, k, v, params, H)
    out = jax.block_until_ready(out)
    assert out.shape == (B, S, F)
    assert jnp.allclose(out, ref, atol=1e-4, rtol=1e-4), "f32 mismatch vs reference"

    # bf16-operand MXU fast path (v6e/v7x) with f32 accumulation; looser
    # tolerance because the un-softmaxed scores are unbounded.
    out_bf16 = multi_head_attention(q, k, v, params, H, compute_dtype=jnp.bfloat16)
    out_bf16 = jax.block_until_ready(out_bf16)
    assert jnp.allclose(out_bf16, ref, atol=1e-1, rtol=1e-1), "bf16 mismatch vs reference"

    print("KERNEL_OK")
</pallas_src>

<mosaic_0001>
module attributes {stable_mosaic.version = 11 : i64} {
  func.func @_mha_kernel(%arg0: i32, %arg1: i32, %arg2: memref<1x8x32xf32, #tpu.memory_space<vmem>>, %arg3: memref<1x8x32xf32, #tpu.memory_space<vmem>>, %arg4: memref<1x8x32xf32, #tpu.memory_space<vmem>>, %arg5: memref<32x32xf32, #tpu.memory_space<vmem>>, %arg6: memref<1x32xf32, #tpu.memory_space<vmem>>, %arg7: memref<32x32xf32, #tpu.memory_space<vmem>>, %arg8: memref<1x32xf32, #tpu.memory_space<vmem>>, %arg9: memref<32x32xf32, #tpu.memory_space<vmem>>, %arg10: memref<1x32xf32, #tpu.memory_space<vmem>>, %arg11: memref<32x32xf32, #tpu.memory_space<vmem>>, %arg12: memref<1x32xf32, #tpu.memory_space<vmem>>, %arg13: memref<1x8x32xf32, #tpu.memory_space<vmem>>, %arg14: memref<8x32xf32, #tpu.memory_space<vmem>>, %arg15: memref<8x32xf32, #tpu.memory_space<vmem>>, %arg16: memref<8x32xf32, #tpu.memory_space<vmem>>) attributes {dimension_semantics = [#tpu.dimension_semantics<parallel>, #tpu.dimension_semantics<arbitrary>], iteration_bounds = array<i64: 2, 1>, scalar_prefetch = 0 : i64, scratch_operands = 3 : i64, tpu.core_type = #tpu.core_type<tc>, window_params = [{transform_indices = @transform_0, window_bounds = array<i64: 1, 8, 32>}, {transform_indices = @transform_1, window_bounds = array<i64: 1, 8, 32>}, {transform_indices = @transform_2, window_bounds = array<i64: 1, 8, 32>}, {pipeline_mode = #tpu.pipeline_mode<synchronous>, transform_indices = @transform_3, window_bounds = array<i64: 32, 32>}, {pipeline_mode = #tpu.pipeline_mode<synchronous>, transform_indices = @transform_4, window_bounds = array<i64: 1, 32>}, {pipeline_mode = #tpu.pipeline_mode<synchronous>, transform_indices = @transform_5, window_bounds = array<i64: 32, 32>}, {pipeline_mode = #tpu.pipeline_mode<synchronous>, transform_indices = @transform_6, window_bounds = array<i64: 1, 32>}, {pipeline_mode = #tpu.pipeline_mode<synchronous>, transform_indices = @transform_7, window_bounds = array<i64: 32, 32>}, {pipeline_mode = #tpu.pipeline_mode<synchronous>, transform_indices = @transform_8, window_bounds = array<i64: 1, 32>}, {pipeline_mode = #tpu.pipeline_mode<synchronous>, transform_indices = @transform_9, window_bounds = array<i64: 32, 32>}, {pipeline_mode = #tpu.pipeline_mode<synchronous>, transform_indices = @transform_10, window_bounds = array<i64: 1, 32>}, {transform_indices = @transform_11, window_bounds = array<i64: 1, 8, 32>}]} {
    %c0_i32 = arith.constant 0 : i32
    %0 = arith.cmpi eq, %arg1, %c0_i32 : i32
    %1 = arith.extui %0 : i1 to i32
    %c0_i32_0 = arith.constant 0 : i32
    %2 = arith.cmpi ne, %1, %c0_i32_0 : i32
    scf.if %2 {
      %c0_35 = arith.constant 0 : index
      %c0_36 = arith.constant 0 : index
      %c0_37 = arith.constant 0 : index
      %47 = vector.load %arg3[%c0_35, %c0_36, %c0_37] : memref<1x8x32xf32, #tpu.memory_space<vmem>>, vector<1x8x32xf32>
      %48 = vector.shape_cast %47 : vector<1x8x32xf32> to vector<8x32xf32>
      %c0_38 = arith.constant 0 : index
      %c0_39 = arith.constant 0 : index
      %c0_40 = arith.constant 0 : index
      %49 = vector.load %arg4[%c0_38, %c0_39, %c0_40] : memref<1x8x32xf32, #tpu.memory_space<vmem>>, vector<1x8x32xf32>
      %50 = vector.shape_cast %49 : vector<1x8x32xf32> to vector<8x32xf32>
      %c0_41 = arith.constant 0 : index
      %c0_42 = arith.constant 0 : index
      %51 = vector.load %arg7[%c0_41, %c0_42] : memref<32x32xf32, #tpu.memory_space<vmem>>, vector<32x32xf32>
      %cst_43 = arith.constant dense<0.000000e+00> : vector<8x32xf32>
      %52 = tpu.matmul %48, %51, %cst_43 {dimension_numbers = #tpu.dot_dimension_numbers<[1], [0], [0], [1], [0, 0, 1, 1], [], []>} : vector<8x32xf32>, vector<32x32xf32>, vector<8x32xf32> -> vector<8x32xf32>
      %c0_44 = arith.constant 0 : index
      %c0_45 = arith.constant 0 : index
      %53 = vector.load %arg8[%c0_44, %c0_45] : memref<1x32xf32, #tpu.memory_space<vmem>>, vector<1x32xf32>
      %54 = vector.broadcast %53 : vector<1x32xf32> to vector<8x32xf32>
      %55 = arith.addf %52, %54 : vector<8x32xf32>
      %cst_46 = arith.constant 0.000000e+00 : f32
      %56 = vector.broadcast %cst_46 : f32 to vector<8x32xf32>
      %57 = arith.maximumf %55, %56 : vector<8x32xf32>
      %c0_47 = arith.constant 0 : index
      %c0_48 = arith.constant 0 : index
      %58 = vector.load %arg9[%c0_47, %c0_48] : memref<32x32xf32, #tpu.memory_space<vmem>>, vector<32x32xf32>
      %cst_49 = arith.constant dense<0.000000e+00> : vector<8x32xf32>
      %59 = tpu.matmul %50, %58, %cst_49 {dimension_numbers = #tpu.dot_dimension_numbers<[1], [0], [0], [1], [0, 0, 1, 1], [], []>} : vector<8x32xf32>, vector<32x32xf32>, vector<8x32xf32> -> vector<8x32xf32>
      %c0_50 = arith.constant 0 : index
      %c0_51 = arith.constant 0 : index
      %60 = vector.load %arg10[%c0_50, %c0_51] : memref<1x32xf32, #tpu.memory_space<vmem>>, vector<1x32xf32>
      %61 = vector.broadcast %60 : vector<1x32xf32> to vector<8x32xf32>
      %62 = arith.addf %59, %61 : vector<8x32xf32>
      %cst_52 = arith.constant 0.000000e+00 : f32
      %63 = vector.broadcast %cst_52 : f32 to vector<8x32xf32>
      %64 = arith.maximumf %62, %63 : vector<8x32xf32>
      %c0_53 = arith.constant 0 : index
      %c0_54 = arith.constant 0 : index
      %65 = vector.load %arg14[%c0_53, %c0_54] : memref<8x32xf32, #tpu.memory_space<vmem>>, vector<8x32xf32>
      tpu.vector_store %arg14[%c0_53, %c0_54], %57 {strides = array<i32>} : memref<8x32xf32, #tpu.memory_space<vmem>>, vector<8x32xf32>,
      %c0_55 = arith.constant 0 : index
      %c0_56 = arith.constant 0 : index
      %66 = vector.load %arg15[%c0_55, %c0_56] : memref<8x32xf32, #tpu.memory_space<vmem>>, vector<8x32xf32>
      tpu.vector_store %arg15[%c0_55, %c0_56], %64 {strides = array<i32>} : memref<8x32xf32, #tpu.memory_space<vmem>>, vector<8x32xf32>,
    } else {
    }
    %c0 = arith.constant 0 : index
    %c0_1 = arith.constant 0 : index
    %c0_2 = arith.constant 0 : index
    %3 = vector.load %arg2[%c0, %c0_1, %c0_2] : memref<1x8x32xf32, #tpu.memory_space<vmem>>, vector<1x8x32xf32>
    %4 = vector.shape_cast %3 : vector<1x8x32xf32> to vector<8x32xf32>
    %c0_3 = arith.constant 0 : index
    %c0_4 = arith.constant 0 : index
    %5 = vector.load %arg5[%c0_3, %c0_4] : memref<32x32xf32, #tpu.memory_space<vmem>>, vector<32x32xf32>
    %cst = arith.constant dense<0.000000e+00> : vector<8x32xf32>
    %6 = tpu.matmul %4, %5, %cst {dimension_numbers = #tpu.dot_dimension_numbers<[1], [0], [0], [1], [0, 0, 1, 1], [], []>} : vector<8x32xf32>, vector<32x32xf32>, vector<8x32xf32> -> vector<8x32xf32>
    %c0_5 = arith.constant 0 : index
    %c0_6 = arith.constant 0 : index
    %7 = vector.load %arg6[%c0_5, %c0_6] : memref<1x32xf32, #tpu.memory_space<vmem>>, vector<1x32xf32>
    %8 = vector.broadcast %7 : vector<1x32xf32> to vector<8x32xf32>
    %9 = arith.addf %6, %8 : vector<8x32xf32>
    %cst_7 = arith.constant 0.000000e+00 : f32
    %10 = vector.broadcast %cst_7 : f32 to vector<8x32xf32>
    %11 = arith.maximumf %9, %10 : vector<8x32xf32>
    %c0_8 = arith.constant 0 : index
    %c0_9 = arith.constant 0 : index
    %12 = vector.load %arg14[%c0_8, %c0_9] : memref<8x32xf32, #tpu.memory_space<vmem>>, vector<8x32xf32>
    %c0_10 = arith.constant 0 : index
    %c0_11 = arith.constant 0 : index
    %13 = vector.load %arg15[%c0_10, %c0_11] : memref<8x32xf32, #tpu.memory_space<vmem>>, vector<8x32xf32>
    %14 = vector.extract_strided_slice %11 {offsets = [0, 0], sizes = [8, 8], strides = [1, 1]} : vector<8x32xf32> to vector<8x8xf32>
    %15 = vector.extract_strided_slice %12 {offsets = [0, 0], sizes = [8, 8], strides = [1, 1]} : vector<8x32xf32> to vector<8x8xf32>
    %cst_12 = arith.constant dense<0.000000e+00> : vector<8x8xf32>
    %16 = tpu.matmul %14, %15, %cst_12 {dimension_numbers = #tpu.dot_dimension_numbers<[1], [1], [0], [0], [0, 0, 1, 0], [], []>} : vector<8x8xf32>, vector<8x8xf32>, vector<8x8xf32> -> vector<8x8xf32>
    %17 = vector.extract_strided_slice %13 {offsets = [0, 0], sizes = [8, 8], strides = [1, 1]} : vector<8x32xf32> to vector<8x8xf32>
    %cst_13 = arith.constant dense<0.000000e+00> : vector<8x8xf32>
    %18 = tpu.matmul %16, %17, %cst_13 {dimension_numbers = #tpu.dot_dimension_numbers<[1], [0], [0], [1], [0, 0, 1, 1], [], []>} : vector<8x8xf32>, vector<8x8xf32>, vector<8x8xf32> -> vector<8x8xf32>
    %c0_14 = arith.constant 0 : index
    %c0_15 = arith.constant 0 : index
    %19 = vector.load %arg16[%c0_14, %c0_15] : memref<8x32xf32, #tpu.memory_space<vmem>>, vector<8x8xf32>
    tpu.vector_store %arg16[%c0_14, %c0_15], %18 {strides = array<i32>} : memref<8x32xf32, #tpu.memory_space<vmem>>, vector<8x8xf32>,
    %20 = vector.extract_strided_slice %11 {offsets = [0, 8], sizes = [8, 8], strides = [1, 1]} : vector<8x32xf32> to vector<8x8xf32>
    %21 = vector.extract_strided_slice %12 {offsets = [0, 8], sizes = [8, 8], strides = [1, 1]} : vector<8x32xf32> to vector<8x8xf32>
    %cst_16 = arith.constant dense<0.000000e+00> : vector<8x8xf32>
    %22 = tpu.matmul %20, %21, %cst_16 {dimension_numbers = #tpu.dot_dimension_numbers<[1], [1], [0], [0], [0, 0, 1, 0], [], []>} : vector<8x8xf32>, vector<8x8xf32>, vector<8x8xf32> -> vector<8x8xf32>
    %23 = vector.extract_strided_slice %13 {offsets = [0, 8], sizes = [8, 8], strides = [1, 1]} : vector<8x32xf32> to vector<8x8xf32>
    %cst_17 = arith.constant dense<0.000000e+00> : vector<8x8xf32>
    %24 = tpu.matmul %22, %23, %cst_17 {dimension_numbers = #tpu.dot_dimension_numbers<[1], [0], [0], [1], [0, 0, 1, 1], [], []>} : vector<8x8xf32>, vector<8x8xf32>, vector<8x8xf32> -> vector<8x8xf32>
    %c0_18 = arith.constant 0 : index
    %c8 = arith.constant 8 : index
    %25 = vector.load %arg16[%c0_18, %c8] : memref<8x32xf32, #tpu.memory_space<vmem>>, vector<8x8xf32>
    tpu.vector_store %arg16[%c0_18, %c8], %24 {strides = array<i32>} : memref<8x32xf32, #tpu.memory_space<vmem>>, vector<8x8xf32>,
    %26 = vector.extract_strided_slice %11 {offsets = [0, 16], sizes = [8, 8], strides = [1, 1]} : vector<8x32xf32> to vector<8x8xf32>
    %27 = vector.extract_strided_slice %12 {offsets = [0, 16], sizes = [8, 8], strides = [1, 1]} : vector<8x32xf32> to vector<8x8xf32>
    %cst_19 = arith.constant dense<0.000000e+00> : vector<8x8xf32>
    %28 = tpu.matmul %26, %27, %cst_19 {dimension_numbers = #tpu.dot_dimension_numbers<[1], [1], [0], [0], [0, 0, 1, 0], [], []>} : vector<8x8xf32>, vector<8x8xf32>, vector<8x8xf32> -> vector<8x8xf32>
    %29 = vector.extract_strided_slice %13 {offsets = [0, 16], sizes = [8, 8], strides = [1, 1]} : vector<8x32xf32> to vector<8x8xf32>
    %cst_20 = arith.constant dense<0.000000e+00> : vector<8x8xf32>
    %30 = tpu.matmul %28, %29, %cst_20 {dimension_numbers = #tpu.dot_dimension_numbers<[1], [0], [0], [1], [0, 0, 1, 1], [], []>} : vector<8x8xf32>, vector<8x8xf32>, vector<8x8xf32> -> vector<8x8xf32>
    %c0_21 = arith.constant 0 : index
    %c16 = arith.constant 16 : index
    %31 = vector.load %arg16[%c0_21, %c16] : memref<8x32xf32, #tpu.memory_space<vmem>>, vector<8x8xf32>
    tpu.vector_store %arg16[%c0_21, %c16], %30 {strides = array<i32>} : memref<8x32xf32, #tpu.memory_space<vmem>>, vector<8x8xf32>,
    %32 = vector.extract_strided_slice %11 {offsets = [0, 24], sizes = [8, 8], strides = [1, 1]} : vector<8x32xf32> to vector<8x8xf32>
    %33 = vector.extract_strided_slice %12 {offsets = [0, 24], sizes = [8, 8], strides = [1, 1]} : vector<8x32xf32> to vector<8x8xf32>
    %cst_22 = arith.constant dense<0.000000e+00> : vector<8x8xf32>
    %34 = tpu.matmul %32, %33, %cst_22 {dimension_numbers = #tpu.dot_dimension_numbers<[1], [1], [0], [0], [0, 0, 1, 0], [], []>} : vector<8x8xf32>, vector<8x8xf32>, vector<8x8xf32> -> vector<8x8xf32>
    %35 = vector.extract_strided_slice %13 {offsets = [0, 24], sizes = [8, 8], strides = [1, 1]} : vector<8x32xf32> to vector<8x8xf32>
    %cst_23 = arith.constant dense<0.000000e+00> : vector<8x8xf32>
    %36 = tpu.matmul %34, %35, %cst_23 {dimension_numbers = #tpu.dot_dimension_numbers<[1], [0], [0], [1], [0, 0, 1, 1], [], []>} : vector<8x8xf32>, vector<8x8xf32>, vector<8x8xf32> -> vector<8x8xf32>
    %c0_24 = arith.constant 0 : index
    %c24 = arith.constant 24 : index
    %37 = vector.load %arg16[%c0_24, %c24] : memref<8x32xf32, #tpu.memory_space<vmem>>, vector<8x8xf32>
    tpu.vector_store %arg16[%c0_24, %c24], %36 {strides = array<i32>} : memref<8x32xf32, #tpu.memory_space<vmem>>, vector<8x8xf32>,
    %c0_25 = arith.constant 0 : index
    %c0_26 = arith.constant 0 : index
    %38 = vector.load %arg16[%c0_25, %c0_26] : memref<8x32xf32, #tpu.memory_space<vmem>>, vector<8x32xf32>
    %c0_27 = arith.constant 0 : index
    %c0_28 = arith.constant 0 : index
    %39 = vector.load %arg11[%c0_27, %c0_28] : memref<32x32xf32, #tpu.memory_space<vmem>>, vector<32x32xf32>
    %cst_29 = arith.constant dense<0.000000e+00> : vector<8x32xf32>
    %40 = tpu.matmul %38, %39, %cst_29 {dimension_numbers = #tpu.dot_dimension_numbers<[1], [0], [0], [1], [0, 0, 1, 1], [], []>} : vector<8x32xf32>, vector<32x32xf32>, vector<8x32xf32> -> vector<8x32xf32>
    %c0_30 = arith.constant 0 : index
    %c0_31 = arith.constant 0 : index
    %41 = vector.load %arg12[%c0_30, %c0_31] : memref<1x32xf32, #tpu.memory_space<vmem>>, vector<1x32xf32>
    %42 = vector.broadcast %41 : vector<1x32xf32> to vector<8x32xf32>
    %43 = arith.addf %40, %42 : vector<8x32xf32>
    %c0_32 = arith.constant 0 : index
    %c0_33 = arith.constant 0 : index
    %c0_34 = arith.constant 0 : index
    %44 = vector.load %arg13[%c0_32, %c0_33, %c0_34] : memref<1x8x32xf32, #tpu.memory_space<vmem>>, vector<1x8x32xf32>
    %45 = vector.shape_cast %44 : vector<1x8x32xf32> to vector<8x32xf32>
    %46 = vector.shape_cast %43 : vector<8x32xf32> to vector<1x8x32xf32>
    tpu.vector_store %arg13[%c0_32, %c0_33, %c0_34], %46 {strides = array<i32>} : memref<1x8x32xf32, #tpu.memory_space<vmem>>, vector<1x8x32xf32>,
    return
  }
  func.func @transform_0(%arg0: i32, %arg1: i32) -> (i32, i32, i32) {
    %c0_i32 = arith.constant 0 : i32
    %c0_i32_0 = arith.constant 0 : i32
    return %arg0, %arg1, %c0_i32 : i32, i32, i32
  }
  func.func @transform_1(%arg0: i32, %arg1: i32) -> (i32, i32, i32) {
    %c0_i32 = arith.constant 0 : i32
    %c0_i32_0 = arith.constant 0 : i32
    %c0_i32_1 = arith.constant 0 : i32
    return %arg0, %c0_i32, %c0_i32_0 : i32, i32, i32
  }
  func.func @transform_2(%arg0: i32, %arg1: i32) -> (i32, i32, i32) {
    %c0_i32 = arith.constant 0 : i32
    %c0_i32_0 = arith.constant 0 : i32
    %c0_i32_1 = arith.constant 0 : i32
    return %arg0, %c0_i32, %c0_i32_0 : i32, i32, i32
  }
  func.func @transform_3(%arg0: i32, %arg1: i32) -> (i32, i32) {
    %c0_i32 = arith.constant 0 : i32
    %c0_i32_0 = arith.constant 0 : i32
    %c0_i32_1 = arith.constant 0 : i32
    return %c0_i32, %c0_i32_0 : i32, i32
  }
  func.func @transform_4(%arg0: i32, %arg1: i32) -> (i32, i32) {
    %c0_i32 = arith.constant 0 : i32
    %c0_i32_0 = arith.constant 0 : i32
    %c0_i32_1 = arith.constant 0 : i32
    return %c0_i32, %c0_i32_0 : i32, i32
  }
  func.func @transform_5(%arg0: i32, %arg1: i32) -> (i32, i32) {
    %c0_i32 = arith.constant 0 : i32
    %c0_i32_0 = arith.constant 0 : i32
    %c0_i32_1 = arith.constant 0 : i32
    return %c0_i32, %c0_i32_0 : i32, i32
  }
  func.func @transform_6(%arg0: i32, %arg1: i32) -> (i32, i32) {
    %c0_i32 = arith.constant 0 : i32
    %c0_i32_0 = arith.constant 0 : i32
    %c0_i32_1 = arith.constant 0 : i32
    return %c0_i32, %c0_i32_0 : i32, i32
  }
  func.func @transform_7(%arg0: i32, %arg1: i32) -> (i32, i32) {
    %c0_i32 = arith.constant 0 : i32
    %c0_i32_0 = arith.constant 0 : i32
    %c0_i32_1 = arith.constant 0 : i32
    return %c0_i32, %c0_i32_0 : i32, i32
  }
  func.func @transform_8(%arg0: i32, %arg1: i32) -> (i32, i32) {
    %c0_i32 = arith.constant 0 : i32
    %c0_i32_0 = arith.constant 0 : i32
    %c0_i32_1 = arith.constant 0 : i32
    return %c0_i32, %c0_i32_0 : i32, i32
  }
  func.func @transform_9(%arg0: i32, %arg1: i32) -> (i32, i32) {
    %c0_i32 = arith.constant 0 : i32
    %c0_i32_0 = arith.constant 0 : i32
    %c0_i32_1 = arith.constant 0 : i32
    return %c0_i32, %c0_i32_0 : i32, i32
  }
  func.func @transform_10(%arg0: i32, %arg1: i32) -> (i32, i32) {
    %c0_i32 = arith.constant 0 : i32
    %c0_i32_0 = arith.constant 0 : i32
    %c0_i32_1 = arith.constant 0 : i32
    return %c0_i32, %c0_i32_0 : i32, i32
  }
  func.func @transform_11(%arg0: i32, %arg1: i32) -> (i32, i32, i32) {
    %c0_i32 = arith.constant 0 : i32
    %c0_i32_0 = arith.constant 0 : i32
    return %arg0, %arg1, %c0_i32 : i32, i32, i32
  }
}

</mosaic_0001>

<bundles_post_ra>
// kernel: tpu_custom_call.1
= control target key start
LH: loop header
LB: loop body
LE: loop exit
PB: predicated region body
PF: predicated region fallthrough
CT: control target
= control target key end

     0   :  { %s2866_s0 = inlined_call_operand.hbm [shape: f32[2,8,32], index: 0, kind: input, shape index: {}]   ;;  %s2867_s1 = inlined_call_operand.hbm [shape: f32[2,8,32], index: 1, kind: input, shape index: {}]   ;;  %s2868_s2 = inlined_call_operand.hbm [shape: f32[2,8,32], index: 2, kind: input, shape index: {}]   ;;  %s2869_s3 = inlined_call_operand.hbm [shape: f32[32,32], index: 3, kind: input, shape index: {}]   ;;  %s2870_s4 = inlined_call_operand.vmem [shape: f32[1,32], index: 4, kind: input, shape index: {}]   ;;  %s2871_s5 = inlined_call_operand.hbm [shape: f32[32,32], index: 5, kind: input, shape index: {}]   ;;  %s2872_s6 = inlined_call_operand.vmem [shape: f32[1,32], index: 6, kind: input, shape index: {}]   ;;  %s2873_s7 = inlined_call_operand.hbm [shape: f32[32,32], index: 7, kind: input, shape index: {}]   ;;  %s2874_s8 = inlined_call_operand.hbm [shape: f32[1,32], index: 8, kind: input, shape index: {}]   ;;  %s2875_s9 = inlined_call_operand.vmem [shape: f32[32,32], index: 9, kind: input, shape index: {}]   ;;  %s2876_s10 = inlined_call_operand.vmem [shape: f32[1,32], index: 10, kind: input, shape index: {}]   ;;  %s2877_s11 = inlined_call_operand.hbm [shape: f32[2,8,32], index: 11, kind: output, shape index: {}]  }
   0x1   :  { %2903 = sst [smem:[#allocation31_spill]] %s2867_s1 }
   0x2   :  { %2904 = sst [smem:[#allocation32_spill]] %s2869_s3 }
   0x3   :  { %2905 = sst [smem:[#allocation33_spill]] %s2873_s7 }
   0x4   :  { %2906 = sst [smem:[#allocation34_spill]] %s2875_s9 }
   0x5   :  { %2907 = sst [smem:[#allocation35_spill]] %s2876_s10 }
   0x6   :  { %2908 = sst [smem:[#allocation36_spill]] %s2877_s11 }
   0x7   :  { %16 = vsyncpa [#allocation6], 0 }
   0x8   :  { %18 = vsyncpa [#allocation6 + $0x1], 0 }
   0x9   :  { %19 = vsyncpa [#allocation9], 0 }
   0xa   :  { %21 = vsyncpa [#allocation9 + $0x1], 0 }
   0xb   :  { %22 = vsyncpa [#allocation12], 0 }
   0xc   :  { %23 = vsyncpa [#allocation15], 0 }
   0xd   :  { %24 = vsyncpa [#allocation7], 0 }
   0xe   :  { %26 = vsyncpa [#allocation7 + $0x1], 0  ;;  %s2400_s17 = smov 0   ;;  %s2402_s18 = smov 0  }
   0xf   :  { %s2404_s19 = smov 0   ;;  %s2406_s20 = smov 0  }
  0x10   :  { %s2408_s21 = smov 0   ;;  %s2410_s22 = smov 0  }
  0x11 LB: > { %2909 = sst [smem:[#allocation23_spill]] %s2299_s17  ;;  %s2431_s23 = sadd.s32 4294967295, %s2319_s22   ;;  %s2319_s22 = sphi %s2410_s22, %s32_s22   ;;  %s2315_s21 = sphi %s2408_s21, %s2956_s21   ;;  %s2311_s20 = sphi %s2406_s20, %s2955_s20   ;;  %s2307_s19 = sphi %s2404_s19, %s2959_s19   ;;  %s2303_s18 = sphi %s2402_s18, %s2958_s18   ;;  %s2299_s17 = sphi %s2400_s17, %s2957_s17  }
  0x12   : > { %2910 = sst [smem:[#allocation24_spill]] %s2311_s20  ;;  %p1710_p0 = scmp.ge.s32.totalorder %s2319_s22, 1 }
  0x13   : > { %2911 = sst [smem:[#allocation25_spill]] %s2315_s21  ;;  %p2887_p1 = scmp.eq.s32.totalorder %s2431_s23, 0 }
  0x14   : > { %2912 = sst [smem:[#allocation26_spill]] %s2319_s22  ;;  %p325_p2 = scmp.lt.s32.totalorder %s2319_s22, 3 }
  0x15   : > { %s2321_s25 = smov [#allocation11]   ;;  %s2322_s28 = smov [#allocation14]  }
  0x16   : > { %p2436_p3 = pnand %p1710_p0, %p325_p2  ;;  %s337_s26 = sshll.u32 %s2321_s25, 4  ;;  %s2440_s26 = int_to_ptr.vmem [resolvable:$true] %s337_s26 }
  0x17   : > { %s369_s29 = sshll.u32 %s2322_s28, 4  ;;  %s2915_s3 = sld [smem:[#allocation32_spill]]  ;;  %s2451_s29 = int_to_ptr.vmem [resolvable:$true] %s369_s29 }
  0x18   : > { %s2913_s24 = scalar_select %p2436_p3, 1, 0 }
  0x19   : > { %p1923_p4 = pneg %p2436_p3 }
  0x1b   : > { %p2447_p6 = pnand %p1923_p4, %p2887_p1 }
  0x1d   : > { %s2914_s27 = scalar_select %p2447_p6, 1, 0 }
  0x1e   : > { %s2023_s13 = scalar_lea.hbm %s2915_s3, 512  ;;  %p2461_p8 = pneg %p2447_p6 }
  0x1f   : > { %p2024_p7 = scmp.ne.s32.totalorder %s2915_s3, %s2023_s13  ;;  %p2030_p11 = scmp.lt.u32.totalorder %s2023_s13, %s2915_s3 }
  0x20   : > { %s2916_s16 = scalar_select %p2461_p8, 1, 0 }
  0x21   : > { %p2026_p9 = pnand %p2461_p8, %p2024_p7 }
  0x23   : > { %p2027_p10 = pneg %p2026_p9 }
  0x25   : > { %p2032_p12 = pnand %p2030_p11, %p2027_p10 }
  0x27   : > { %2035 = shalt.err (!%p2032_p12)
}
  0x28   : > { %s2036_s30 = scalar_lea.vmem %s2440_s26, 512  ;;  %p2044_p4 = scmp.lt.s32.totalorder %s2440_s26, %s2440_s26 }
  0x29   : > { %p2037_p13 = scmp.ne.s32.totalorder %s2440_s26, %s2036_s30  ;;  %p2045_p5 = scmp.lt.s32.totalorder %s2036_s30, %s2036_s30 }
  0x2b   : > { %p2039_p0 = pnand %p2037_p13, %p2461_p8  ;;  %p2046_p7 = por %p2045_p5, %p2044_p4 }
  0x2d   : > { %p2040_p2 = pneg %p2039_p0 }
  0x2f   : > { %p2047_p9 = pnand %p2046_p7, %p2040_p2 }
  0x31   : > { %2050 = shalt.err (!%p2047_p9)
}
  0x32   : > { %s2880_s12 = smov 128   ;;  %s2881_s13 = smov 8  }
  0x33   : > { %1926 = dma.hbm_to_vmem [thread:$0]  (!%p2447_p6), %s2915_s3, 512, %s2440_s26, [#allocation12], %s2880_s12, %s2880_s12, %s2881_s13  }
  0x34   : > { %s2917_s7 = sld [smem:[#allocation33_spill]] }
  0x3a   : > { %s2051_s30 = scalar_lea.hbm %s2917_s7, 512 }
  0x3b   : > { %p2052_p5 = scmp.ne.s32.totalorder %s2917_s7, %s2051_s30  ;;  %p2058_p12 = scmp.lt.u32.totalorder %s2051_s30, %s2917_s7 }
  0x3d   : > { %p2054_p10 = pnand %p2052_p5, %p2461_p8 }
  0x3f   : > { %p2055_p11 = pneg %p2054_p10 }
  0x41   : > { %p2060_p13 = pnand %p2058_p12, %p2055_p11 }
  0x43   : > { %2063 = shalt.err (!%p2060_p13)
}
  0x44   : > { %s2064_s26 = scalar_lea.vmem %s2451_s29, 512  ;;  %p2072_p7 = scmp.lt.s32.totalorder %s2451_s29, %s2451_s29 }
  0x45   : > { %p2065_p0 = scmp.ne.s32.totalorder %s2451_s29, %s2064_s26  ;;  %p2073_p9 = scmp.lt.s32.totalorder %s2064_s26, %s2064_s26 }
  0x47   : > { %p2067_p2 = pnand %p2065_p0, %p2461_p8  ;;  %p2074_p5 = por %p2073_p9, %p2072_p7 }
  0x49   : > { %p2068_p4 = pneg %p2067_p2 }
  0x4b   : > { %p2075_p10 = pnand %p2074_p5, %p2068_p4 }
  0x4d   : > { %2078 = shalt.err (!%p2075_p10)
}
  0x4e   : > { %1932 = dma.hbm_to_vmem [thread:$0]  (!%p2447_p6), %s2917_s7, 512, %s2451_s29, [#allocation15], %s2880_s12, %s2880_s12, %s2881_s13  }
  0x4f   : > { %s1709_s11 = sadd.s32 4294967294, %s2319_s22   ;;  %s44_s20 = sadd.s32 1, %s2315_s21 }
  0x50   : > { %p46_p11 = scmp.ge.s32.totalorder %s44_s20, 2  ;;  %s53_s14 = sadd.s32 1, %s2307_s19 }
  0x51   : > { %p60_p12 = scmp.ne.s32.totalorder %s2307_s19, %s2303_s18  ;;  %p61_p13 = scmp.eq.s32.totalorder %s2319_s22, 0 }
  0x52   : > { %s2961_s20 = smov (%p46_p11, %s44_s20), 0  ;;  %p66_p2 = scmp.ne.s32.totalorder %s2303_s18, %s2299_s17 }
  0x53   : > { %2918 = sst [smem:[#allocation27_spill]] %s2961_s20  ;;  %p2519_p0 = por %p61_p13, %p60_p12 }
  0x54   : > { %s48_s29 = ssub.s32 %s2315_s21, %s2961_s20  ;;  %p312_p4 = scmp.eq.s32.totalorder %s2431_s23, 1 }
  0x55   : > { %p51_p7 = scmp.eq.s32.totalorder %s48_s29, 0  ;;  %p2530_p9 = por %p2887_p1, %p66_p2 }
  0x56   : > { %p2534_p5 = por %p312_p4, %p60_p12  ;;  %p318_p10 = scmp.eq.s32.totalorder %s1709_s11, 1 }
  0x57   : > { %s2920_s25 = scalar_select %p2530_p9, 1, 0 }
  0x58   : > { %s2921_s28 = scalar_select %p2534_p5, 1, 0 }
  0x59   : > { %s2539_s30 = scalar_select %p51_p7, %s2307_s19, %s53_s14  }
  0x5a   : > { %2922 = sst [smem:[#allocation28_spill]] %s2921_s28  ;;  %p2541_p11 = por %p318_p10, %p66_p2 }
  0x5b   : > { %2923 = sst [smem:[#allocation29_spill]] %s2539_s30  ;;  %p1954_p13 = scmp.lt.s32.totalorder %s2319_s22, 2 }
  0x5c   : > { %s2924_s26 = scalar_select %p2541_p11, 1, 0 }
  0x5d   : > { %s2882_s9 = sand.u32 1, %s2307_s19   ;;  %s2548_s10 = sshll.u32 %s2315_s21, 7 }
  0x5e   : > { %2925 = sst [smem:[#allocation30_spill]] %s2924_s26  ;;  %s2552_s29 = sshll.u32 %s2882_s9, 3 }
  0x5f   : > { %p2556_p12 = pnand %p1954_p13, %p2519_p0  ;;  %s419_s11 = sand.u32 1, %s2319_s22  }
  0x60   : > { %s2927_s1 = sld [smem:[#allocation31_spill]]  ;;  %s423_s7 = scalar_lea.vmem [#allocation8], %s2552_s29 }
  0x61   : > { %s2926_s12 = scalar_select %p2556_p12, 1, 0 }
  0x62   : > { %s430_s9 = sshll.u32 %s423_s7, 4  ;;  %s2570_s15 = scalar_lea.sflag [#allocation9], %s419_s11  ;;  %s2568_s9 = int_to_ptr.vmem [resolvable:$true] %s430_s9 }
  0x63   : > { %p2576_p2 = pneg %p2556_p12 }
  0x65   : > { %s2928_s21 = scalar_select %p2576_p2, 1, 0 }
  0x66   : > { %s2565_s3 = scalar_lea.hbm %s2927_s1, %s2548_s10  ;;  %s2084_s30 = scalar_lea.hbm %s2927_s1, 256 }
  0x67   : > { %s2079_s20 = scalar_lea.hbm %s2565_s3, 128  ;;  %p2085_p10 = scmp.lt.u32.totalorder %s2565_s3, %s2927_s1 }
  0x68   : > { %p2080_p0 = scmp.ne.s32.totalorder %s2565_s3, %s2079_s20  ;;  %p2086_p13 = scmp.lt.u32.totalorder %s2084_s30, %s2079_s20 }
  0x69   : > { %p2088_p11 = scmp.lt.u32.totalorder %s2079_s20, %s2565_s3 }
  0x6a   : > { %p2082_p4 = pnand %p2576_p2, %p2080_p0  ;;  %p2087_p1 = por %p2086_p13, %p2085_p10 }
  0x6c   : > { %p2083_p7 = pneg %p2082_p4  ;;  %p2089_p5 = por %p2088_p11, %p2087_p1 }
  0x6e   : > { %p2090_p9 = pnand %p2089_p5, %p2083_p7 }
  0x70   : > { %2093 = shalt.err (!%p2090_p9)
}
  0x71   : > { %s2094_s11 = scalar_lea.vmem %s2568_s9, 128  ;;  %s2325_s13 = smov [#allocation8]  }
  0x72   : > { %p2095_p0 = scmp.ne.s32.totalorder %s2568_s9, %s2094_s11  ;;  %s2099_s14 = sshll.u32 %s2325_s13, 4  ;;  %s2100_s14 = int_to_ptr.vmem [resolvable:$false] %s2099_s14 }
  0x73   : > { %s2101_s22 = scalar_lea.vmem %s2100_s14, 256  ;;  %p2102_p6 = scmp.lt.s32.totalorder %s2568_s9, %s2100_s14 }
  0x74   : > { %p2097_p4 = pnand %p2095_p0, %p2576_p2  ;;  %p2103_p8 = scmp.lt.s32.totalorder %s2101_s22, %s2094_s11 }
  0x76   : > { %p2098_p3 = pneg %p2097_p4  ;;  %p2104_p10 = por %p2103_p8, %p2102_p6 }
  0x78   : > { %p2105_p13 = pnand %p2104_p10, %p2098_p3 }
  0x7a   : > { %2108 = shalt.err (!%p2105_p13)
}
  0x7b   : > { %1942 = dma.hbm_to_vmem [thread:$0]  (!%p2556_p12), %s2565_s3, 128, %s2568_s9, %s2570_s15  }
  0x7c   : > { %s2326_s20 = smov [#allocation13]   ;;  %s2327_s7 = smov [#allocation16]  }
  0x7d   : > { %s353_s30 = sshll.u32 %s2326_s20, 4  ;;  %s383_s1 = sshll.u32 %s2327_s7, 4  ;;  %s354_s30 = int_to_ptr.vmem [resolvable:$true] %s353_s30  ;;  %s384_s1 = int_to_ptr.vmem [resolvable:$true] %s383_s1 }
  0x7e   : > { %s2109_s14 = scalar_lea.hbm %s2871_s5, 512  ;;  %p2929_p3 = scmp.ne.s32.totalorder %s2916_s16, 0 }
  0x7f   : > { %p2110_p1 = scmp.ne.s32.totalorder %s2871_s5, %s2109_s14  ;;  %p2116_p9 = scmp.lt.u32.totalorder %s2109_s14, %s2871_s5 }
  0x81   : > { %p2112_p6 = pnand %p2110_p1, %p2929_p3 }
  0x83   : > { %p2113_p8 = pneg %p2112_p6 }
  0x85   : > { %p2118_p5 = pnand %p2116_p9, %p2113_p8 }
  0x87   : > { %2121 = shalt.err (!%p2118_p5)
}
  0x88   : > { %s2122_s3 = scalar_lea.vmem %s354_s30, 512  ;;  %p2130_p4 = scmp.lt.s32.totalorder %s354_s30, %s354_s30 }
  0x89   : > { %p2123_p11 = scmp.ne.s32.totalorder %s354_s30, %s2122_s3  ;;  %p2131_p10 = scmp.lt.s32.totalorder %s2122_s3, %s2122_s3 }
  0x8b   : > { %p2125_p7 = pnand %p2123_p11, %p2929_p3  ;;  %p2132_p13 = por %p2131_p10, %p2130_p4 }
  0x8d   : > { %p2126_p0 = pneg %p2125_p7 }
  0x8f   : > { %p2133_p12 = pnand %p2132_p13, %p2126_p0 }
  0x91   : > { %2136 = shalt.err (!%p2133_p12)
}
  0x92   : > { %p2930_p1 = scmp.ne.s32.totalorder %s2914_s27, 0  ;;  %s2931_s26 = smov 8  }
  0x93   : > { %s2932_s9 = smov 128   ;;  %s2137_s13 = scalar_lea.hbm %s2874_s8, 16 }
  0x94   : > { %1929 = dma.hbm_to_vmem [thread:$0]  (!%p2930_p1), %s2871_s5, 512, %s354_s30, [#allocation12], %s2932_s9, %s2932_s9, %s2931_s26  }
  0x95   : > { %p2138_p6 = scmp.ne.s32.totalorder %s2874_s8, %s2137_s13  ;;  %p2144_p9 = scmp.lt.u32.totalorder %s2137_s13, %s2874_s8 }
  0x97   : > { %p2140_p12 = pnand %p2138_p6, %p2929_p3 }
  0x99   : > { %p2141_p8 = pneg %p2140_p12 }
  0x9b   : > { %p2146_p5 = pnand %p2144_p9, %p2141_p8 }
  0x9d   : > { %2149 = shalt.err (!%p2146_p5)
}
  0x9e   : > { %s2150_s17 = scalar_lea.vmem %s384_s1, 16  ;;  %s2157_s30 = scalar_lea.vmem %s384_s1, 32 }
  0x9f   : > { %p2151_p11 = scmp.ne.s32.totalorder %s384_s1, %s2150_s17  ;;  %p2158_p4 = scmp.lt.s32.totalorder %s384_s1, %s384_s1 }
  0xa0   : > { %p2159_p10 = scmp.lt.s32.totalorder %s2157_s30, %s2150_s17 }
  0xa1   : > { %p2153_p7 = pnand %p2151_p11, %p2929_p3 }
  0xa2   : > { %p2160_p13 = por %p2159_p10, %p2158_p4 }
  0xa3   : > { %p2154_p0 = pneg %p2153_p7 }
  0xa5   : > { %p2161_p2 = pnand %p2160_p13, %p2154_p0 }
  0xa7   : > { %2164 = shalt.err (!%p2161_p2)
}
  0xa8   : > { %1935 = dma.hbm_to_vmem [thread:$0]  (!%p2930_p1), %s2874_s8, 16, %s384_s1, [#allocation15]  }
  0xa9   : > { %s2643_s20 = scalar_lea.hbm %s2866_s0, %s2548_s10  ;;  %s404_s7 = scalar_lea.vmem [#allocation5], %s2552_s29 }
  0xaa   : > { %s412_s27 = sshll.u32 %s404_s7, 4  ;;  %s2652_s11 = scalar_lea.hbm %s2868_s2, %s2548_s10  ;;  %s2646_s27 = int_to_ptr.vmem [resolvable:$true] %s412_s27 }
  0xab   : > { %s2933_s22 = sand.u32 1, %s2307_s19   ;;  %s2165_s3 = scalar_lea.hbm %s2643_s20, 128 }
  0xac   : > { %s401_s1 = scalar_lea.sflag [#allocation6], %s2933_s22  ;;  %p2166_p2 = scmp.ne.s32.totalorder %s2643_s20, %s2165_s3 }
  0xad   : > { %p2934_p3 = scmp.ne.s32.totalorder %s2928_s21, 0  ;;  %s2170_s26 = scalar_lea.hbm %s2866_s0, 256 }
  0xae   : > { %p2171_p12 = scmp.lt.u32.totalorder %s2643_s20, %s2866_s0  ;;  %p2172_p8 = scmp.lt.u32.totalorder %s2170_s26, %s2165_s3 }
  0xaf   : > { %p2168_p1 = pnand %p2166_p2, %p2934_p3  ;;  %p2174_p5 = scmp.lt.u32.totalorder %s2165_s3, %s2643_s20 }
  0xb0   : > { %p2173_p9 = por %p2172_p8, %p2171_p12 }
  0xb1   : > { %p2169_p6 = pneg %p2168_p1 }
  0xb2   : > { %p2175_p11 = por %p2174_p5, %p2173_p9 }
  0xb4   : > { %p2176_p7 = pnand %p2175_p11, %p2169_p6 }
  0xb6   : > { %2179 = shalt.err (!%p2176_p7)
}
  0xb7   : > { %s2180_s10 = scalar_lea.vmem %s2646_s27, 128  ;;  %s2328_s28 = smov [#allocation5]  }
  0xb8   : > { %p2181_p0 = scmp.ne.s32.totalorder %s2646_s27, %s2180_s10  ;;  %s2185_s7 = sshll.u32 %s2328_s28, 4  ;;  %s2186_s7 = int_to_ptr.vmem [resolvable:$false] %s2185_s7 }
  0xb9   : > { %s2187_s13 = scalar_lea.vmem %s2186_s7, 256  ;;  %p2188_p13 = scmp.lt.s32.totalorder %s2646_s27, %s2186_s7 }
  0xba   : > { %p2183_p4 = pnand %p2181_p0, %p2934_p3  ;;  %p2189_p2 = scmp.lt.s32.totalorder %s2187_s13, %s2180_s10 }
  0xbc   : > { %p2184_p10 = pneg %p2183_p4  ;;  %p2190_p1 = por %p2189_p2, %p2188_p13 }
  0xbe   : > { %p2191_p12 = pnand %p2190_p1, %p2184_p10 }
  0xc0   : > { %2194 = shalt.err (!%p2191_p12)
}
  0xc1   : > { %p2935_p6 = scmp.ne.s32.totalorder %s2926_s12, 0  ;;  %s441_s14 = scalar_lea.vmem [#allocation10], %s2552_s29 }
  0xc2   : > { %s448_s22 = sshll.u32 %s441_s14, 4  ;;  %s2195_s3 = scalar_lea.hbm %s2652_s11, 128  ;;  %s449_s22 = int_to_ptr.vmem [resolvable:$true] %s448_s22 }
  0xc3   : > { %1939 = dma.hbm_to_vmem [thread:$0]  (!%p2935_p6), %s2643_s20, 128, %s2646_s27, %s401_s1  }
  0xc4   : > { %p2196_p8 = scmp.ne.s32.totalorder %s2652_s11, %s2195_s3  ;;  %s2200_s26 = scalar_lea.hbm %s2868_s2, 256 }
  0xc5   : > { %p2201_p11 = scmp.lt.u32.totalorder %s2652_s11, %s2868_s2  ;;  %p2202_p7 = scmp.lt.u32.totalorder %s2200_s26, %s2195_s3 }
  0xc6   : > { %p2198_p9 = pnand %p2196_p8, %p2934_p3  ;;  %p2204_p4 = scmp.lt.u32.totalorder %s2195_s3, %s2652_s11 }
  0xc7   : > { %p2203_p0 = por %p2202_p7, %p2201_p11 }
  0xc8   : > { %p2199_p5 = pneg %p2198_p9 }
  0xc9   : > { %p2205_p10 = por %p2204_p4, %p2203_p0 }
  0xcb   : > { %p2206_p13 = pnand %p2205_p10, %p2199_p5 }
  0xcd   : > { %2209 = shalt.err (!%p2206_p13)
}
  0xce   : > { %s2210_s29 = scalar_lea.vmem %s449_s22, 128  ;;  %s2329_s20 = smov [#allocation10]  }
  0xcf   : > { %p2211_p2 = scmp.ne.s32.totalorder %s449_s22, %s2210_s29  ;;  %s2215_s27 = sshll.u32 %s2329_s20, 4  ;;  %s2216_s27 = int_to_ptr.vmem [resolvable:$false] %s2215_s27 }
  0xd0   : > { %s2217_s1 = scalar_lea.vmem %s2216_s27, 256  ;;  %p2218_p8 = scmp.lt.s32.totalorder %s449_s22, %s2216_s27 }
  0xd1   : > { %p2213_p1 = pnand %p2211_p2, %p2934_p3  ;;  %p2219_p9 = scmp.lt.s32.totalorder %s2217_s1, %s2210_s29 }
  0xd3   : > { %p2214_p12 = pneg %p2213_p1  ;;  %p2220_p6 = por %p2219_p9, %p2218_p8 }
  0xd5   : > { %p2221_p7 = pnand %p2220_p6, %p2214_p12 }
  0xd7   : > { %2224 = shalt.err (!%p2221_p7)
}
  0xd8   : > { %p2936_p11 = scmp.ne.s32.totalorder %s2926_s12, 0  ;;  %p2937_p5 = scmp.ne.s32.totalorder %s2913_s24, 0 }
  0xd9   : > { %s2699_s21 = sand.u32 (!%p2937_p5), 1, %s2303_s18   ;;  %p2938_p3 = scmp.ne.s32.totalorder (!%p2937_p5), %s2920_s25, 0 }
  0xda   : > { %1945 = dma.hbm_to_vmem [thread:$0]  (!%p2936_p11), %s2652_s11, 128, %s449_s22, %s2570_s15  }
  0xdb   : > { %457 = sbr.rel (%p2937_p5) target bundleno = 1475 (0x5c3), region = 64  ;;  %s2702_s10 = sshll.u32 (!%p2937_p5), %s2699_s21, 3 }
  0xdc   : > { %s460_s28 = scalar_lea.sflag (!%p2937_p5), [#allocation6], %s2699_s21  ;;  %s463_s7 = scalar_lea.vmem (!%p2937_p5), [#allocation5], %s2702_s10 }
  0xe2   : > { %2278 = dma.done.wait (%p2938_p3), %s460_s28, 128  }
  0xe3   : > { %2280 = vsyncadd (%p2938_p3), %s460_s28, 4294967168  ;;  %s468_s24 = sand.u32 1, %s2431_s23   ;;  %s472_s15 = scalar_lea.vmem [#allocation8], %s2702_s10 }
  0xe4   : > { %s469_s12 = scalar_lea.sflag [#allocation9], %s468_s24 }
  0xe5   : > { %2282 = dma.done.wait (%p2938_p3), %s469_s12, 256  }
  0xe6   : > { %2284 = vsyncadd (%p2938_p3), %s469_s12, 4294967040  ;;  %s481_s11 = scalar_lea.vmem [#allocation10], %s2702_s10  ;;  %p2939_p6 = scmp.eq.s32.totalorder %s2431_s23, 0 }
  0xe8   : > { %2286 = dma.done.wait (%p2939_p6), [#allocation12], 1024   ;;  %p2940_p0 = pmov %p2939_p6 }
  0xea   : > { %2288 = vsyncadd (%p2940_p0), [#allocation12], 4294966272  ;;  %p2941_p4 = pmov %p2940_p0 }
  0xeb   : > { %p2942_p10 = pmov %p2940_p0 }
  0xec   : > { %2290 = dma.done.wait (%p2941_p4), [#allocation15], 528  }
  0xed   : > { %2292 = vsyncadd (%p2942_p10), [#allocation15], 4294966768  ;;  %v2330_v0 = vmov 0.0|0.0   ;;  %vm2331_vm0 = vmmov 0   ;;  %v2332_v1 = vmov 0.0   ;;  %v552_v2 = vld [vmem:[#allocation13] sm:$0xff] }
  0xee   : > { %1875 = vmatprep.subr.bf16.mxu0 %v2330_v0  ;;  %1799 = vmatprep.mubr.msk.f32.mxu0 %vm2331_vm0, %v2332_v1  ;;  %v553_v3 = vld [vmem:[#allocation13 + $0x8] sm:$0xff]  ;;  %v554_v4 = vld [vmem:[#allocation13 + $0x10] sm:$0xff]  ;;  %v555_v6 = vld [vmem:[#allocation13 + $0x18] sm:$0xff]  ;;  %vm563_vm1 = vcmask 261120   ;;  %vm814_vm2 = vcmask 64512   ;;  %s2333_s22 = smov 112  }
  0xef   : > { %1881 = vmatprep.subr.bf16.mxu1 %v2330_v0  ;;  %1810 = vmatprep.mubr.msk.f32.mxu1 %vm2331_vm0, %v2332_v1  ;;  %v1876_v5 = vpack.c.bf16 %v553_v3, %v552_v2  ;;  %v1879_v7 = vpack.c.bf16 %v555_v6, %v554_v4  ;;  %v726_v8 = vld [vmem:[#allocation11] sm:$0xff]  ;;  %v639_v10 = vld [vmem:[#allocation14 + $0x8] sm:$0xff]  ;;  %v640_v13 = vld [vmem:[#allocation14 + $0x10] sm:$0xff]  ;;  %s2334_s3 = smov 120   ;;  %s2335_s17 = smov 104   ;;  %vm1124_vm3 = vcmask 130112  }
  0xf0   : > { %v638_v9 = vld [vmem:[#allocation14] sm:$0xff]  ;;  %v727_v11 = vld [vmem:[#allocation11 + $0x8] sm:$0xff]  ;;  %v641_v14 = vld [vmem:[#allocation14 + $0x18] sm:$0xff]  ;;  %s2943_s9 = sld [smem:[#allocation34_spill]]  ;;  %s2337_s24 = smov 16   ;;  %vm1284_vm4 = vcmask 195712  }
  0xf1   : > { %1877 = vmatpush3.bf16.msra.mxu0 %v1876_v5  ;;  %v1882_v12 = vpack.c.bf16 %v639_v10, %v638_v9  ;;  %v1885_v15 = vpack.c.bf16 %v641_v14, %v640_v13  ;;  %v550_v16 = vld [vmem:[%s472_s15] sm:$0xff]  ;;  %v1888_v17 = vpack.c.bf16 %v727_v11, %v726_v8  ;;  %v728_v18 = vld [vmem:[#allocation11 + $0x10] sm:$0xff]  ;;  %v729_v19 = vld [vmem:[#allocation11 + $0x18] sm:$0xff]  ;;  %s2944_s12 = sld [smem:[#allocation24_spill]]  ;;  %s2338_s15 = smov 24   ;;  %vm1444_vm5 = vcmask 261312  }
  0xf2   : > { %1878 = vmatprep.subr.bf16.mxu0 %v2330_v0  ;;  %v551_v20 = vld [vmem:[%s481_s11] sm:$0xff]  ;;  %v1891_v21 = vpack.c.bf16 %v729_v19, %v728_v18  ;;  %v1733_v33 = vld [vmem:[#allocation16] ss:$0 sm:$0xff]  ;;  %s2945_s11 = sld [smem:[#allocation28_spill]]  ;;  %s2947_s26 = sld [smem:[#allocation36_spill]] }
  0xf3   : > { %1883 = vmatpush3.bf16.msra.mxu1 %v1882_v12  ;;  %v725_v22 = vld [vmem:[%s463_s7] sm:$0xff]  ;;  %s2336_s7 = smov 8   ;;  %s2946_s13 = sld [smem:[#allocation35_spill]] }
  0xf4   : > { %1884 = vmatprep.subr.bf16.mxu1 %v2330_v0  ;;  %v1731_v23 = vld [vmem:[%s2872_s6] ss:$0 sm:$0xff]  ;;  %s1533_s29 = scalar_lea.sflag [#allocation7], %s2699_s21 }
  0xf5   : > { %1880 = vmatpush3.bf16.msra.mxu0 %v1879_v7  ;;  %v1735_v28 = vld [vmem:[%s2870_s4] ss:$0 sm:$0xff] }
  0xf6   : > { %1887 = vmatprep.subr.bf16.mxu0 %v2330_v0  ;;  %v1447_v59 = vld [vmem:[%s2943_s9] sm:$0xff]  ;;  %v1448_v60 = vld [vmem:[%s2943_s9 + $0x8] sm:$0xff]  ;;  %v1449_v62 = vld [vmem:[%s2943_s9 + $0x10] sm:$0xff] }
  0xf7   : > { %1886 = vmatpush3.bf16.msra.mxu1 %v1885_v15  ;;  %v1894_v61 = vpack.c.bf16 %v1448_v60, %v1447_v59  ;;  %v1450_v63 = vld [vmem:[%s2943_s9 + $0x18] sm:$0xff]  ;;  %s1752_s14 = sshll.u32 %s2944_s12, 7 }
  0xf8   : > { %1800 = vmatmul.mubr.msk.f32.vlgmr.msra.gmra.mrb[0].mxu0 %vm563_vm1, %v550_v16  ;;  %1824 = vmatprep.subr.mxu1 %v2332_v1  ;;  %s2816_s16 = scalar_lea.hbm %s2947_s26, %s1752_s14  ;;  %p2948_p2 = scmp.ne.s32.totalorder %s2945_s11, 0 }
  0xf9   : > { %1889 = vmatpush3.bf16.msra.mxu0 %v1888_v17  ;;  %1821 = vmatprep.mubr.msk.f32.mxu0 %vm2331_vm0, %v2332_v1  ;;  %v1749_v11 = vld [vmem:[%s2946_s13] ss:$0 sm:$0xff] }
  0xfa   : > { %1890 = vmatprep.subr.bf16.mxu0 %v2330_v0  ;;  %1811 = vmatmul.mubr.msk.f32.vlgmr.msra.gmra.mrb[0].mxu1 %vm563_vm1, %v551_v20 }
  0xfb   : > { %1826 = vmatprep.mubr.msk.f32.mxu1 %vm2331_vm0, %v2332_v1 }
  0xfd   : > { %1892 = vmatpush3.bf16.msra.mxu0 %v1891_v21 }
  0xfe   : > { %1844 = vmatprep.subr.mxu0 %v2332_v1 }
 0x100   : > { %1822 = vmatmul.mubr.msk.f32.vlgmr.msra.gmra.mrb[2].mxu0 %vm563_vm1, %v725_v22 }
 0x101   : > { %1846 = vmatprep.mubr.msk.f32.mxu0 %vm2331_vm0, %v2332_v1 }
 0x1cb   : > { %v633_v24 = vpop.f32.mrb[0].mxu0 }
 0x1cc   : > { %v634_v25 = vadd.f32 %v1731_v23, %v633_v24  ;;  %v1801_v26 = vpop.f32.mrb[1].mxu0 }
 0x1cd   : > { %v718_v34 = vpop.f32.mrb[0].mxu1 }
 0x1ce   : > { %v637_v27 = vmax.f32 %v634_v25, 0.0  ;;  %v719_v36 = vadd.f32 %v1733_v33, %v718_v34  ;;  %v1812_v37 = vpop.f32.mrb[1].mxu1 }
 0x1d0   : > { %723 = vst.msk [vmem:[#allocation2] sm:$0xff] %vm563_vm1, %v637_v27  ;;  %v722_v38 = vmax.f32 %v719_v36, 0.0 }
 0x1d2   : > { %724 = vst.msk [vmem:[#allocation3] sm:$0xff] %vm563_vm1, %v722_v38 }
 0x1d3   : > { %v807_v29 = vpop.f32.mrb[2].mxu0 }
 0x1d4   : > { %v808_v30 = vadd.f32 %v1735_v28, %v807_v29  ;;  %v1823_v31 = vpop.f32.mrb[3].mxu0 }
 0x1d6   : > { %v811_v35 = vmax.f32 %v808_v30, 0.0 }
 0x1d7   : > { %v812_v32 = vld [vmem:[#allocation2] sm:$0xff] }
 0x1d8   : > { %1128 = vrot.lane.b32.xlu1 %v812_v32, %s2333_s22  ;;  %967 = vrot.lane.b32.xlu0 %v812_v32, %s2334_s3 }
 0x1d9   : > { %1825 = vmatpush3.xpose.msk.msra.mxu1 %vm814_vm2, %v812_v32  ;;  %v813_v39 = vld [vmem:[#allocation3] sm:$0xff] }
 0x1da   : > { %1829 = vmatprep.subr.mxu1 %v2332_v1 }
 0x1dc   : > { %1827 = vmatmul.mubr.msk.f32.vlgmr.msra.gmra.mrb[2].mxu1 %vm814_vm2, %v811_v35  ;;  %1126 = vrot.lane.b32.xlu1 %v811_v35, %s2333_s22 }
 0x1dd   : > { %965 = vrot.lane.b32.xlu0 %v811_v35, %s2334_s3  ;;  %1831 = vmatprep.mubr.msk.f32.mxu1 %vm2331_vm0, %v2332_v1 }
 0x1de   : > { %1830 = vmatpush3.msra.mxu1 %v813_v39 }
 0x1df   : > { %1834 = vmatprep.subr.mxu1 %v2332_v1 }
 0x1e0   : > { %1286 = vrot.lane.b32.xlu1 %v811_v35, %s2335_s17 }
 0x1e1   : > { %1288 = vrot.lane.b32.xlu0 %v812_v32, %s2335_s17 }
 0x1e4   : > { %1204 = vrot.lane.b32.xlu1 %v813_v39, %s2333_s22  ;;  %s545_s22 = scalar_lea.vmem [#allocation17], %s2702_s10  ;;  %s2339_s10 = smov [#allocation17]  }
 0x1e5   : > { %1044 = vrot.lane.b32.xlu0 %v813_v39, %s2334_s3  ;;  %s1547_s3 = sshll.u32 %s545_s22, 4  ;;  %s2229_s27 = sshll.u32 %s2339_s10, 4  ;;  %s2818_s3 = int_to_ptr.vmem [resolvable:$true] %s1547_s3  ;;  %s2230_s27 = int_to_ptr.vmem [resolvable:$false] %s2229_s27 }
 0x1e6   : > { %s2225_s20 = scalar_lea.vmem %s2818_s3, 128  ;;  %s2231_s1 = scalar_lea.vmem %s2230_s27, 256 }
 0x1e7   : > { %p2226_p13 = scmp.ne.s32.totalorder %s2818_s3, %s2225_s20  ;;  %p2232_p8 = scmp.lt.s32.totalorder %s2818_s3, %s2230_s27 }
 0x1e8   : > { %p2233_p9 = scmp.lt.s32.totalorder %s2231_s1, %s2225_s20 }
 0x1e9   : > { %1364 = vrot.lane.b32.xlu0 %v813_v39, %s2335_s17  ;;  %p2227_p1 = pnand %p2226_p13, %p2948_p2 }
 0x1ea   : > { %p2234_p7 = por %p2233_p9, %p2232_p8 }
 0x1eb   : > { %p2228_p12 = pneg %p2227_p1 }
 0x1ed   : > { %p2235_p11 = pnand %p2234_p7, %p2228_p12 }
 0x24a   : > { %v1129_v40 = vpop.permute.xlu1 %1128  ;;  %v968_v41 = vpop.permute.xlu0 %967 }
 0x24b   : > { %1845 = vmatpush3.xpose.msk.msra.mxu0 %vm814_vm2, %v1129_v40 }
 0x24c   : > { %1854 = vmatprep.subr.mxu0 %v2332_v1 }
 0x24e   : > { %v1127_v42 = vpop.permute.xlu1 %1126 }
 0x24f   : > { %v966_v43 = vpop.permute.xlu0 %965  ;;  %1847 = vmatmul.mubr.msk.f32.vlgmr.msra.gmra.mrb[4].mxu0 %vm814_vm2, %v1127_v42 }
 0x250   : > { %1856 = vmatprep.mubr.msk.f32.mxu0 %vm2331_vm0, %v2332_v1 }
 0x252   : > { %v1287_v45 = vpop.permute.xlu1 %1286 }
 0x253   : > { %v1289_v44 = vpop.permute.xlu0 %1288 }
 0x254   : > { %1855 = vmatpush3.xpose.msk.msra.mxu0 %vm814_vm2, %v1289_v44 }
 0x255   : > { %1893 = vmatprep.subr.bf16.mxu0 %v2330_v0 }
 0x256   : > { %v1205_v56 = vpop.permute.xlu1 %1204 }
 0x257   : > { %1857 = vmatmul.mubr.msk.f32.vlgmr.msra.gmra.mrb[6].mxu0 %vm814_vm2, %v1287_v45  ;;  %v1045_v48 = vpop.permute.xlu0 %1044 }
 0x258   : > { %1872 = vmatprep.mubr.msk.f32.mxu0 %vm2331_vm0, %v2332_v1  ;;  %1895 = vmatpush3.bf16.msra.mxu0 %v1894_v61 }
 0x259   : > { %1896 = vmatprep.subr.bf16.mxu0 %v2330_v0 }
 0x25b   : > { %v1365_v58 = vpop.permute.xlu0 %1364 }
 0x2af   : > { %v887_v46 = vpop.f32.mrb[2].mxu1 }
 0x2b0   : > { %v1828_v47 = vpop.f32.mrb[3].mxu1  ;;  %1832 = vmatmul.mubr.msk.f32.vlgmr.msra.gmra.mrb[4].mxu1 %vm814_vm2, %v887_v46 }
 0x2b1   : > { %1835 = vmatpush3.xpose.msk.msra.mxu1 %vm814_vm2, %v968_v41  ;;  %1836 = vmatprep.mubr.msk.f32.mxu1 %vm2331_vm0, %v2332_v1 }
 0x2b2   : > { %1839 = vmatprep.subr.mxu1 %v2332_v1 }
 0x2b4   : > { %1837 = vmatmul.mubr.msk.f32.vlgmr.msra.gmra.mrb[6].mxu1 %vm814_vm2, %v966_v43 }
 0x2b5   : > { %1840 = vmatpush3.msra.mxu1 %v1045_v48  ;;  %1841 = vmatprep.mubr.msk.f32.mxu1 %vm2331_vm0, %v2332_v1 }
 0x2b6   : > { %1849 = vmatprep.subr.mxu1 %v2332_v1 }
 0x322   : > { %v1200_v49 = vpop.f32.mrb[4].mxu0 }
 0x323   : > { %v1848_v50 = vpop.f32.mrb[5].mxu0 }
 0x32a   : > { %v1360_v51 = vpop.f32.mrb[6].mxu0 }
 0x32b   : > { %v1858_v52 = vpop.f32.mrb[7].mxu0 }
 0x383   : > { %v960_v53 = vpop.f32.mrb[4].mxu1 }
 0x384   : > { %964 = vst.msk [vmem:[#allocation4] sm:$0xff] %vm814_vm2, %v960_v53  ;;  %v1833_v54 = vpop.f32.mrb[5].mxu1 }
 0x387   : > { %v1039_v55 = vpop.f32.mrb[6].mxu1 }
 0x388   : > { %v1838_v57 = vpop.f32.mrb[7].mxu1  ;;  %1842 = vmatmul.mubr.msk.f32.vlgmr.msra.gmra.mrb[8].mxu1 %vm814_vm2, %v1039_v55 }
 0x389   : > { %1850 = vmatpush3.msra.mxu1 %v1205_v56  ;;  %1851 = vmatprep.mubr.msk.f32.mxu1 %vm2331_vm0, %v2332_v1 }
 0x38a   : > { %1859 = vmatprep.subr.mxu1 %v2332_v1 }
 0x38c   : > { %1852 = vmatmul.mubr.msk.f32.vlgmr.msra.gmra.mrb[10].mxu1 %vm814_vm2, %v1200_v49 }
 0x38d   : > { %1860 = vmatpush3.msra.mxu1 %v1365_v58  ;;  %1861 = vmatprep.mubr.msk.f32.mxu1 %vm2331_vm0, %v2332_v1  ;;  %v1897_v1 = vpack.c.bf16 %v1450_v63, %v1449_v62 }
 0x38f   : > { %1898 = vmatpush3.bf16.msra.mxu0 %v1897_v1 }
 0x390   : > { %1862 = vmatmul.mubr.msk.f32.vlgmr.msra.gmra.mrb[12].mxu1 %vm814_vm2, %v1360_v51 }
 0x45b   : > { %v1116_v2 = vpop.f32.mrb[8].mxu1 }
 0x45c   : > { %1121 = vrot.lane.b32.xlu1 %v1116_v2, %s2336_s7  ;;  %v1843_v3 = vpop.f32.mrb[9].mxu1 }
 0x45f   : > { %v1276_v4 = vpop.f32.mrb[10].mxu1 }
 0x460   : > { %1281 = vrot.lane.b32.xlu0 %v1276_v4, %s2337_s24  ;;  %v1853_v5 = vpop.f32.mrb[11].mxu1 }
 0x463   : > { %v1436_v6 = vpop.f32.mrb[12].mxu1 }
 0x464   : > { %1441 = vrot.lane.b32.xlu1 %v1436_v6, %s2338_s15  ;;  %v1863_v7 = vpop.f32.mrb[13].mxu1 }
 0x4ce   : > { %v1122_v8 = vpop.permute.xlu1 %1121 }
 0x4cf   : > { %1125 = vst.msk [vmem:[#allocation4] sm:$0xff] %vm1124_vm3, %v1122_v8 }
 0x4d2   : > { %v1282_v0 = vpop.permute.xlu0 %1281 }
 0x4d3   : > { %1285 = vst.msk [vmem:[#allocation4] sm:$0xff] %vm1284_vm4, %v1282_v0 }
 0x4d6   : > { %v1442_v9 = vpop.permute.xlu1 %1441 }
 0x4d7   : > { %1445 = vst.msk [vmem:[#allocation4] sm:$0xff] %vm1444_vm5, %v1442_v9 }
 0x4de   : > { %v1446_v10 = vld [vmem:[#allocation4] sm:$0xff] }
 0x4df   : > { %1873 = vmatmul.mubr.msk.f32.vlgmr.msra.gmra.mrb[8].mxu0 %vm563_vm1, %v1446_v10 }
 0x5b2   : > { %v1527_v12 = vpop.f32.mrb[8].mxu0 }
 0x5b3   : > { %v1528_v13 = vadd.f32 %v1749_v11, %v1527_v12  ;;  %v1874_v14 = vpop.f32.mrb[9].mxu0 }
 0x5b5   : > { %1531 = vst.msk [vmem:[%s545_s22] sm:$0xff] %vm563_vm1, %v1528_v13 }
 0x5b6   : > { %2238 = shalt.err (!%p2235_p11)
}
 0x5b7   : > { %s2239_s21 = scalar_lea.hbm %s2816_s16, 128  ;;  %s2243_s24 = scalar_lea.hbm %s2947_s26, 256 }
 0x5b8   : > { %p2240_p5 = scmp.ne.s32.totalorder %s2816_s16, %s2239_s21  ;;  %p2244_p0 = scmp.lt.u32.totalorder %s2816_s16, %s2947_s26 }
 0x5b9   : > { %p2245_p4 = scmp.lt.u32.totalorder %s2243_s24, %s2239_s21  ;;  %p2247_p13 = scmp.lt.u32.totalorder %s2239_s21, %s2816_s16 }
 0x5ba   : > { %p2241_p3 = pnand %p2240_p5, %p2948_p2 }
 0x5bb   : > { %p2246_p10 = por %p2245_p4, %p2244_p0 }
 0x5bc   : > { %p2242_p6 = pneg %p2241_p3 }
 0x5bd   : > { %p2248_p1 = por %p2247_p13, %p2246_p10 }
 0x5bf   : > { %p2249_p12 = pnand %p2248_p1, %p2242_p6 }
 0x5c1   : > { %2252 = shalt.err (!%p2249_p12)
}
 0x5c2   : > { %1921 = dma.vmem_to_hbm [thread:$0]  (%p2948_p2), %s2818_s3, 128, %s2816_s16, %s1533_s29  }
 0x5c3 PF: > { %s2949_s23 = sld [smem:[#allocation23_spill]]  ;;  %s2950_s25 = sld [smem:[#allocation30_spill]] }
 0x5c4   : > { %s2951_s13 = sld [smem:[#allocation26_spill]] }
 0x5c9   : > { %s1559_s14 = sand.u32 1, %s2949_s23   ;;  %p2952_p8 = scmp.ne.s32.totalorder %s2950_s25, 0 }
 0x5ca   : > { %p2953_p9 = scmp.ge.s32.totalorder %s2951_s13, 2  ;;  %s1560_s22 = scalar_lea.sflag [#allocation7], %s1559_s14 }
 0x5cc   : > { %p1947_p7 = pnand %p2953_p9, %p2952_p8 }
 0x5ce   : > { %2294 = dma.done.wait (!%p1947_p7), %s1560_s22, 128  }
 0x5cf   : > { %2296 = vsyncadd (!%p1947_p7), %s1560_s22, 4294967168  ;;  %s32_s22 = sadd.s32 1, %s2951_s13   ;;  %s2954_s11 = sld [smem:[#allocation29_spill]] }
 0x5d0   : > { %p29_p11 = scmp.ge.s32.totalorder %s32_s22, 4   ;;  %s2955_s20 = sld [smem:[#allocation25_spill]] }
 0x5d1   : > { %s2956_s21 = sld [smem:[#allocation27_spill]]  ;;  %s2957_s17 = smov %s2303_s18 }
 0x5d2   : > { %s2958_s18 = smov %s2307_s19  ;;  %31 = sbr.rel (!%p29_p11) target bundleno = 17 (0x11), region = 153 }
 0x5d5   : > { %s2959_s19 = smov %s2954_s11 }
 0x5d9   :  { %1565 = vsyncpa [#allocation6], 1 }
 0x5da   :  { %1567 = vsyncpa [#allocation6 + $0x1], 1 }
 0x5db   :  { %1568 = vsyncpa [#allocation9], 1 }
 0x5dc   :  { %1570 = vsyncpa [#allocation9 + $0x1], 1 }
 0x5dd   :  { %1571 = vsyncpa [#allocation12], 1 }
 0x5de   :  { %1572 = vsyncpa [#allocation15], 1 }
 0x5df   :  { %1573 = vsyncpa [#allocation7], 1 }
 0x5e0   :  { %1575 = vsyncpa [#allocation7 + $0x1], 1 }

</bundles_post_ra>
